<compile_context>
chip_gen: v6e
topology: v6e:2x2x1
jax: 0.10.0
libtpu: 0.0.40
codegen_flags: <defaults>
</compile_context>

<pallas_src>
import functools

import jax
import jax.numpy as jnp
from jax import lax
from jax.experimental import pallas as pl
from jax.experimental.pallas import tpu as pltpu


_MAX_BLOCK_BYTES = 8 * 1024 * 1024    # cap on the f32 working set of one x block (v7x-safe)
_VMEM_LIMIT_BYTES = 56 * 1024 * 1024  # ~6x block footprint; below v7x's 64 MiB physical VMEM
_MIN_ROWS = 128                       # don't shrink blocks below this many sublane rows


def my_layernorm_kernel(x_ref, gamma_ref, o_ref, *, eps: float):
    x = x_ref[...].astype(jnp.float32)                    # (Bt, L, C)

    # --- LayerNorm statistics over the channel (lane) dim; biased variance,
    #     eps inside sqrt — matches torch.nn.LayerNorm ---
    mean = jnp.mean(x, axis=-1, keepdims=True)             # (Bt, L, 1)
    xc = x - mean
    var = jnp.mean(xc * xc, axis=-1, keepdims=True)        # (Bt, L, 1)
    y = xc * lax.rsqrt(var + eps)                          # rsqrt -> EUP slot

    # --- subtract the per-(batch, channel) mean over the sequence (sublane)
    #     dim.  beta cancels exactly; gamma factors out of the subtraction ---
    y = y - jnp.mean(y, axis=1, keepdims=True)             # (Bt, L, C)
    gamma = gamma_ref[...].astype(jnp.float32)             # (1, C)
    o_ref[...] = (y * gamma[None, :, :]).astype(o_ref.dtype)


def _pick_batch_tile(B: int, L: int, C: int) -> int:
    """Largest batch tile whose f32 x-block fits the VMEM byte budget.

    Keeps the grid length >= 2 (so both v7x TensorCores get work) as long as
    that doesn't shrink the block below _MIN_ROWS sublane rows.
    """
    row_bytes = max(L * C * 4, 1)                          # f32 bytes per batch element
    bt = max(1, min(B, _MAX_BLOCK_BYTES // row_bytes))
    if -(-B // bt) < 2 and bt > 1 and (-(-bt // 2)) * L >= _MIN_ROWS:
        bt = -(-bt // 2)
    return bt


def my_layernorm_forward(x, gamma, beta=None, *, eps: float = 1e-5,
                         batch_tile: int | None = None):
    """x: [B, L, C]; gamma/beta: [C] (nn.LayerNorm weight/bias).

    `beta` is accepted for API parity with nn.LayerNorm but cancels exactly in
    x_hat - mean(x_hat, dim=1), so it is never transferred or read.
    """
    del beta
    B, L, C = x.shape
    bt = batch_tile if batch_tile is not None else _pick_batch_tile(B, L, C)
    bt = max(1, min(bt, B))

    # Pad B up to a multiple of the tile.  Batch elements are independent, so
    # zero-padding is exact; the pad rows are sliced off after the call.
    B_pad = -(-B // bt) * bt
    x_in = x if B_pad == B else jnp.pad(x, ((0, B_pad - B), (0, 0), (0, 0)))
    g2 = gamma.reshape(1, C)

    kernel = functools.partial(my_layernorm_kernel, eps=eps)

    out = pl.pallas_call(
        kernel,
        out_shape=jax.ShapeDtypeStruct((B_pad, L, C), x.dtype),
        grid_spec=pltpu.PrefetchScalarGridSpec(
            num_scalar_prefetch=0,
            grid=(B_pad // bt,),
            in_specs=[
                pl.BlockSpec((bt, L, C), lambda i: (i, 0, 0)),  # x
                pl.BlockSpec((1, C), lambda i: (0, 0)),          # gamma
            ],
            out_specs=pl.BlockSpec((bt, L, C), lambda i: (i, 0, 0)),
        ),
        compiler_params=pltpu.CompilerParams(
            dimension_semantics=("parallel",),   # shards batch tiles across TCs on v7x
            vmem_limit_bytes=_VMEM_LIMIT_BYTES,
        ),
    )(x_in, g2)

    return out if B_pad == B else out[:B]


def reference_forward(x, gamma, beta, eps: float = 1e-5):
    """Pure-JAX reference matching PyTorch my_Layernorm (eval mode)."""
    mean = jnp.mean(x, axis=-1, keepdims=True)
    var = jnp.mean((x - mean) ** 2, axis=-1, keepdims=True)
    x_hat = (x - mean) / jnp.sqrt(var + eps) * gamma + beta
    bias = jnp.mean(x_hat, axis=1, keepdims=True)
    return x_hat - bias


if __name__ == "__main__":
    # Small shapes consistent with the module: x is [batch, seq_len, channels].
    # C = 128 keeps every load/store lane-dense (no masked vst).
    B, L, C = 8, 64, 128

    key = jax.random.PRNGKey(0)
    kx, kg, kb = jax.random.split(key, 3)
    x = jax.random.normal(kx, (B, L, C), dtype=jnp.float32)
    gamma = 1.0 + 0.1 * jax.random.normal(kg, (C,), dtype=jnp.float32)
    beta = 0.1 * jax.random.normal(kb, (C,), dtype=jnp.float32)

    out = my_layernorm_forward(x, gamma, beta)
    jax.block_until_ready(out)
    out_ref = reference_forward(x, gamma, beta)
    assert out.shape == (B, L, C)
    assert jnp.allclose(out, out_ref, atol=1e-4, rtol=1e-4), "my_Layernorm mismatch"

    # Exercise the batch-padding path (B not divisible by the tile).
    x_odd = jax.random.normal(jax.random.PRNGKey(1), (5, 32, C), dtype=jnp.float32)
    out_odd = my_layernorm_forward(x_odd, gamma, beta, batch_tile=2)
    jax.block_until_ready(out_odd)
    assert jnp.allclose(out_odd, reference_forward(x_odd, gamma, beta),
                        atol=1e-4, rtol=1e-4), "my_Layernorm padded-batch mismatch"

    print("KERNEL_OK")
</pallas_src>

<mosaic_0001>
module attributes {stable_mosaic.version = 11 : i64} {
  func.func @my_layernorm_kernel(%arg0: i32, %arg1: memref<4x64x128xf32, #tpu.memory_space<vmem>>, %arg2: memref<1x128xf32, #tpu.memory_space<vmem>>, %arg3: memref<4x64x128xf32, #tpu.memory_space<vmem>>) attributes {dimension_semantics = [#tpu.dimension_semantics<parallel>], iteration_bounds = array<i64: 2>, scalar_prefetch = 0 : i64, scratch_operands = 0 : i64, tpu.core_type = #tpu.core_type<tc>, window_params = [{transform_indices = @transform_0, window_bounds = array<i64: 4, 64, 128>}, {pipeline_mode = #tpu.pipeline_mode<synchronous>, transform_indices = @transform_1, window_bounds = array<i64: 1, 128>}, {transform_indices = @transform_2, window_bounds = array<i64: 4, 64, 128>}]} {
    %c0 = arith.constant 0 : index
    %c0_0 = arith.constant 0 : index
    %c0_1 = arith.constant 0 : index
    %0 = vector.load %arg1[%c0, %c0_0, %c0_1] : memref<4x64x128xf32, #tpu.memory_space<vmem>>, vector<4x64x128xf32>
    %cst = arith.constant dense<0.000000e+00> : vector<4x64xf32>
    %1 = vector.multi_reduction <add>, %0, %cst [2] : vector<4x64x128xf32> to vector<4x64xf32>
    %2 = vector.shape_cast %1 : vector<4x64xf32> to vector<4x64x1xf32>
    %cst_2 = arith.constant 1.280000e+02 : f32
    %3 = vector.broadcast %cst_2 : f32 to vector<4x64x1xf32>
    %4 = arith.divf %2, %3 : vector<4x64x1xf32>
    %5 = vector.broadcast %4 : vector<4x64x1xf32> to vector<4x64x128xf32>
    %6 = arith.subf %0, %5 : vector<4x64x128xf32>
    %7 = arith.mulf %6, %6 : vector<4x64x128xf32>
    %cst_3 = arith.constant dense<0.000000e+00> : vector<4x64xf32>
    %8 = vector.multi_reduction <add>, %7, %cst_3 [2] : vector<4x64x128xf32> to vector<4x64xf32>
    %9 = vector.shape_cast %8 : vector<4x64xf32> to vector<4x64x1xf32>
    %cst_4 = arith.constant 1.280000e+02 : f32
    %10 = vector.broadcast %cst_4 : f32 to vector<4x64x1xf32>
    %11 = arith.divf %9, %10 : vector<4x64x1xf32>
    %cst_5 = arith.constant 9.99999974E-6 : f32
    %12 = vector.broadcast %cst_5 : f32 to vector<4x64x1xf32>
    %13 = arith.addf %11, %12 : vector<4x64x1xf32>
    %14 = math.rsqrt %13 : vector<4x64x1xf32>
    %15 = vector.broadcast %14 : vector<4x64x1xf32> to vector<4x64x128xf32>
    %16 = arith.mulf %6, %15 : vector<4x64x128xf32>
    %cst_6 = arith.constant dense<0.000000e+00> : vector<4x128xf32>
    %17 = vector.multi_reduction <add>, %16, %cst_6 [1] : vector<4x64x128xf32> to vector<4x128xf32>
    %18 = vector.shape_cast %17 : vector<4x128xf32> to vector<4x1x128xf32>
    %cst_7 = arith.constant 6.400000e+01 : f32
    %19 = vector.broadcast %cst_7 : f32 to vector<4x1x128xf32>
    %20 = arith.divf %18, %19 : vector<4x1x128xf32>
    %21 = vector.broadcast %20 : vector<4x1x128xf32> to vector<4x64x128xf32>
    %22 = arith.subf %16, %21 : vector<4x64x128xf32>
    %c0_8 = arith.constant 0 : index
    %c0_9 = arith.constant 0 : index
    %23 = vector.load %arg2[%c0_8, %c0_9] : memref<1x128xf32, #tpu.memory_space<vmem>>, vector<1x128xf32>
    %24 = vector.shape_cast %23 : vector<1x128xf32> to vector<1x1x128xf32>
    %25 = vector.broadcast %24 : vector<1x1x128xf32> to vector<4x64x128xf32>
    %26 = arith.mulf %22, %25 : vector<4x64x128xf32>
    %c0_10 = arith.constant 0 : index
    %c0_11 = arith.constant 0 : index
    %c0_12 = arith.constant 0 : index
    %27 = vector.load %arg3[%c0_10, %c0_11, %c0_12] : memref<4x64x128xf32, #tpu.memory_space<vmem>>, vector<4x64x128xf32>
    tpu.vector_store %arg3[%c0_10, %c0_11, %c0_12], %26 {strides = array<i32>} : memref<4x64x128xf32, #tpu.memory_space<vmem>>, vector<4x64x128xf32>,
    return
  }
  func.func @transform_0(%arg0: i32) -> (i32, i32, i32) {
    %c0_i32 = arith.constant 0 : i32
    %c0_i32_0 = arith.constant 0 : i32
    %c0_i32_1 = arith.constant 0 : i32
    return %arg0, %c0_i32, %c0_i32_0 : i32, i32, i32
  }
  func.func @transform_1(%arg0: i32) -> (i32, i32) {
    %c0_i32 = arith.constant 0 : i32
    %c0_i32_0 = arith.constant 0 : i32
    %c0_i32_1 = arith.constant 0 : i32
    return %c0_i32, %c0_i32_0 : i32, i32
  }
  func.func @transform_2(%arg0: i32) -> (i32, i32, i32) {
    %c0_i32 = arith.constant 0 : i32
    %c0_i32_0 = arith.constant 0 : i32
    %c0_i32_1 = arith.constant 0 : i32
    return %arg0, %c0_i32, %c0_i32_0 : i32, i32, i32
  }
}

</mosaic_0001>

<bundles_post_ra>
// kernel: tpu_custom_call.1
= control target key start
LH: loop header
LB: loop body
LE: loop exit
PB: predicated region body
PF: predicated region fallthrough
CT: control target
= control target key end

     0   :  { %7 = vsyncpa [#allocation3], 0  ;;  %s1736_s0 = inlined_call_operand.hbm [shape: f32[8,64,128], index: 0, kind: input, shape index: {}]   ;;  %s1737_s1 = inlined_call_operand.vmem [shape: f32[1,128], index: 1, kind: input, shape index: {}]   ;;  %s1738_s2 = inlined_call_operand.hbm [shape: f32[8,64,128], index: 2, kind: output, shape index: {}]  }
   0x1   :  { %9 = vsyncpa [#allocation3 + $0x1], 0 }
   0x2   :  { %10 = vsyncpa [#allocation4], 0 }
   0x3   :  { %12 = vsyncpa [#allocation4 + $0x1], 0  ;;  %s1048_s9 = smov 0   ;;  %s1050_s10 = smov 0  }
   0x4   :  { %s1052_s11 = smov 0   ;;  %s1054_s12 = smov 0  }
   0x5 LB: > { %s1069_s13 = sadd.s32 4294967295, %s1025_s12   ;;  %s798_s14 = sadd.s32 4294967294, %s1025_s12   ;;  %s1025_s12 = sphi %s1054_s12, %s1753_s12   ;;  %s1021_s11 = sphi %s1052_s11, %s1752_s11   ;;  %s1017_s10 = sphi %s1050_s10, %s1751_s10   ;;  %s1013_s9 = sphi %s1048_s9, %s1750_s9  }
   0x6   : > { %s1073_s15 = sadd.s32 1, %s1025_s12   ;;  %s25_s16 = sadd.s32 1, %s1021_s11 }
   0x7   : > { %s22_s17 = ssub.s32 %s1025_s12, %s1073_s15  ;;  %p32_p0 = scmp.ne.s32.totalorder %s1021_s11, %s1017_s10 }
   0x8   : > { %p23_p1 = scmp.eq.s32.totalorder %s22_s17, 0  ;;  %p33_p2 = scmp.eq.s32.totalorder %s1025_s12, 0 }
   0x9   : > { %p38_p3 = scmp.ne.s32.totalorder %s1017_s10, %s1013_s9  ;;  %p39_p4 = scmp.eq.s32.totalorder %s1069_s13, 0 }
   0xa   : > { %s1085_s18 = scalar_select %p23_p1, %s1021_s11, %s25_s16  }
   0xb   : > { %p1087_p5 = por %p33_p2, %p32_p0  ;;  %p1091_p6 = por %p39_p4, %p38_p3 }
   0xc   : > { %p83_p7 = scmp.eq.s32.totalorder %s1069_s13, 1  ;;  %p89_p8 = scmp.eq.s32.totalorder %s798_s14, 1 }
   0xd   : > { %s1742_s20 = scalar_select %p1091_p6, 1, 0 }
   0xe   : > { %p831_p10 = scmp.lt.s32.totalorder %s1025_s12, 2  ;;  %p1098_p11 = por %p83_p7, %p32_p0 }
   0xf   : > { %p1102_p12 = por %p89_p8, %p38_p3  ;;  %s112_s23 = sand.u32 1, %s1021_s11  }
  0x10   : > { %s1743_s21 = scalar_select %p1098_p11, 1, 0 }
  0x11   : > { %s1744_s22 = scalar_select %p1102_p12, 1, 0 }
  0x12   : > { %s816_s24 = sshll.u32 %s1025_s12, 12  ;;  %s801_s25 = sshll.u32 %s112_s23, 8 }
  0x13   : > { %s1111_s28 = scalar_lea.hbm %s1736_s0, %s816_s24  ;;  %s116_s29 = scalar_lea.vmem [#allocation2], %s801_s25 }
  0x14   : > { %s124_s30 = sshll.u32 %s116_s29, 4  ;;  %p1115_p13 = pnand %p831_p10, %p1087_p5  ;;  %s1119_s30 = int_to_ptr.vmem [resolvable:$true] %s124_s30 }
  0x15   : > { %s1121_s4 = scalar_lea.sflag [#allocation3], %s112_s23  ;;  %s933_s5 = scalar_lea.hbm %s1111_s28, 4096 }
  0x16   : > { %p934_p0 = scmp.ne.s32.totalorder %s1111_s28, %s933_s5  ;;  %p935_p1 = pneg %p1115_p13 }
  0x17   : > { %s938_s8 = scalar_lea.hbm %s1736_s0, 8192  ;;  %p939_p4 = scmp.lt.s32.totalorder %s1111_s28, %s1736_s0 }
  0x18   : > { %p936_p2 = pnand %p935_p1, %p934_p0  ;;  %p940_p5 = scmp.lt.s32.totalorder %s938_s8, %s933_s5 }
  0x1a   : > { %p937_p3 = pneg %p936_p2  ;;  %p941_p7 = por %p940_p5, %p939_p4 }
  0x1c   : > { %p942_p8 = pnand %p941_p7, %p937_p3 }
  0x1e   : > { %945 = shalt.err (!%p942_p8)
}
  0x1f   : > { %s946_s17 = scalar_lea.vmem %s1119_s30, 4096  ;;  %s1027_s19 = smov [#allocation2]  }
  0x20   : > { %p947_p10 = scmp.ne.s32.totalorder %s1119_s30, %s946_s17  ;;  %s951_s23 = sshll.u32 %s1027_s19, 4  ;;  %s952_s23 = int_to_ptr.vmem [resolvable:$false] %s951_s23 }
  0x21   : > { %s953_s24 = scalar_lea.vmem %s952_s23, 8192  ;;  %p954_p2 = scmp.lt.s32.totalorder %s1119_s30, %s952_s23 }
  0x22   : > { %p949_p9 = pnand %p947_p10, %p935_p1  ;;  %p955_p12 = scmp.lt.s32.totalorder %s953_s24, %s946_s17 }
  0x24   : > { %p950_p0 = pneg %p949_p9  ;;  %p956_p11 = por %p955_p12, %p954_p2 }
  0x26   : > { %p957_p6 = pnand %p956_p11, %p950_p0 }
  0x28   : > { %960 = shalt.err (!%p957_p6)
}
  0x29   : > { %s1028_s25 = smov 128   ;;  %s1029_s26 = smov 8  }
  0x2a   : > { %826 = dma.hbm_to_vmem [thread:$0]  (!%p1115_p13), %s1111_s28, 4096, %s1119_s30, %s1121_s4, %s1028_s25, %s1028_s25, %s1029_s26  }
  0x2b   : > { %p805_p9 = scmp.ge.s32.totalorder %s1025_s12, 1  ;;  %p132_p1 = scmp.lt.s32.totalorder %s1025_s12, 3 }
  0x2d   : > { %p133_p3 = pnand %p805_p9, %p132_p1 }
  0x2e   : > { %s1145_s27 = sand.u32 (!%p133_p3), 1, %s1017_s10   ;;  %p1746_p6 = scmp.ne.s32.totalorder (!%p133_p3), %s1742_s20, 0 }
  0x2f   : > { %136 = sbr.rel (%p133_p3) target bundleno = 466 (0x1d2), region = 28  ;;  %s806_s29 = sshll.u32 (!%p133_p3), %s1145_s27, 8 }
  0x30   : > { %s139_s5 = scalar_lea.sflag (!%p133_p3), [#allocation3], %s1145_s27  ;;  %s1151_s6 = scalar_lea.vmem (!%p133_p3), [#allocation2], %s806_s29 }
  0x34   : > { %1004 = dma.done.wait (%p1746_p6), %s139_s5, 4096  }
  0x35   : > { %1006 = vsyncadd (%p1746_p6), %s139_s5, 4294963200  ;;  %v1158_v0 = vld [vmem:[%s1151_s6] sm:$0xff]  ;;  %v1166_v2 = vld [vmem:[%s1151_s6 + $0x8] sm:$0xff]  ;;  %s1604_s30 = scalar_lea.vmem [#allocation5], %s806_s29  ;;  %s818_s3 = sshll.u32 %s1069_s13, 12 }
  0x36   : > { %v1161_v1 = vld [vmem:[%s1151_s6 + $0x40] sm:$0xff]  ;;  %197 = vadd.xlane.f32.xlu0 %v1158_v0  ;;  %v1169_v3 = vld [vmem:[%s1151_s6 + $0x48] sm:$0xff]  ;;  %v1190_v8 = vld [vmem:[%s1151_s6 + $0x10] sm:$0xff]  ;;  %s725_s4 = sshll.u32 %s1604_s30, 4  ;;  %s1679_s8 = scalar_lea.hbm %s1738_s2, %s818_s3  ;;  %s1681_s4 = int_to_ptr.vmem [resolvable:$true] %s725_s4 }
  0x37   : > { %213 = vadd.xlane.f32.xlu1 %v1161_v1  ;;  %v1174_v4 = vld [vmem:[%s1151_s6 + $0x80] sm:$0xff]  ;;  %v1177_v5 = vld [vmem:[%s1151_s6 + $0x88] sm:$0xff]  ;;  %v1193_v9 = vld [vmem:[%s1151_s6 + $0x50] sm:$0xff]  ;;  %s711_s14 = scalar_lea.sflag [#allocation4], %s1145_s27  ;;  %s961_s16 = scalar_lea.vmem %s1681_s4, 4096 }
  0x38   : > { %v1182_v6 = vld [vmem:[%s1151_s6 + $0xc0] sm:$0xff]  ;;  %v1185_v7 = vld [vmem:[%s1151_s6 + $0xc8] sm:$0xff]  ;;  %v1198_v10 = vld [vmem:[%s1151_s6 + $0x90] sm:$0xff]  ;;  %p962_p11 = scmp.ne.s32.totalorder %s1681_s4, %s961_s16  ;;  %p1747_p12 = scmp.ne.s32.totalorder %s1743_s21, 0 }
  0x39   : > { %v1201_v11 = vld [vmem:[%s1151_s6 + $0xd0] sm:$0xff]  ;;  %v1206_v12 = vld [vmem:[%s1151_s6 + $0x18] sm:$0xff]  ;;  %v1222_v16 = vld [vmem:[%s1151_s6 + $0x20] sm:$0xff]  ;;  %s1030_s17 = smov [#allocation5]  }
  0x3a   : > { %199 = vadd.xlane.f32.xlu0 %v1166_v2  ;;  %v1209_v13 = vld [vmem:[%s1151_s6 + $0x58] sm:$0xff]  ;;  %v1225_v17 = vld [vmem:[%s1151_s6 + $0x60] sm:$0xff]  ;;  %v1238_v20 = vld [vmem:[%s1151_s6 + $0x28] sm:$0xff]  ;;  %p963_p13 = pnand %p962_p11, %p1747_p12  ;;  %s965_s19 = sshll.u32 %s1030_s17, 4  ;;  %s966_s19 = int_to_ptr.vmem [resolvable:$false] %s965_s19 }
  0x3b   : > { %215 = vadd.xlane.f32.xlu1 %v1169_v3  ;;  %v1214_v14 = vld [vmem:[%s1151_s6 + $0x98] sm:$0xff]  ;;  %v1230_v18 = vld [vmem:[%s1151_s6 + $0xa0] sm:$0xff]  ;;  %v1241_v21 = vld [vmem:[%s1151_s6 + $0x68] sm:$0xff]  ;;  %s967_s23 = scalar_lea.vmem %s966_s19, 8192  ;;  %p968_p5 = scmp.lt.s32.totalorder %s1681_s4, %s966_s19 }
  0x3c   : > { %v1217_v15 = vld [vmem:[%s1151_s6 + $0xd8] sm:$0xff]  ;;  %v1233_v19 = vld [vmem:[%s1151_s6 + $0xe0] sm:$0xff]  ;;  %v1246_v22 = vld [vmem:[%s1151_s6 + $0xa8] sm:$0xff]  ;;  %p964_p4 = pneg %p963_p13  ;;  %p969_p7 = scmp.lt.s32.totalorder %s967_s23, %s961_s16 }
  0x3d   : > { %v1249_v23 = vld [vmem:[%s1151_s6 + $0xe8] sm:$0xff]  ;;  %v1254_v24 = vld [vmem:[%s1151_s6 + $0x30] sm:$0xff]  ;;  %v1270_v28 = vld [vmem:[%s1151_s6 + $0x38] sm:$0xff] }
  0x3e   : > { %229 = vadd.xlane.f32.xlu0 %v1174_v4  ;;  %v1257_v25 = vld [vmem:[%s1151_s6 + $0x70] sm:$0xff]  ;;  %v1273_v29 = vld [vmem:[%s1151_s6 + $0x78] sm:$0xff]  ;;  %p970_p8 = por %p969_p7, %p968_p5 }
  0x3f   : > { %231 = vadd.xlane.f32.xlu1 %v1177_v5  ;;  %v1262_v26 = vld [vmem:[%s1151_s6 + $0xb0] sm:$0xff]  ;;  %v1278_v30 = vld [vmem:[%s1151_s6 + $0xb8] sm:$0xff] }
  0x40   : > { %v1265_v27 = vld [vmem:[%s1151_s6 + $0xf0] sm:$0xff]  ;;  %v1281_v31 = vld [vmem:[%s1151_s6 + $0xf8] sm:$0xff]  ;;  %p971_p10 = pnand %p970_p8, %p964_p4 }
  0x42   : > { %245 = vadd.xlane.f32.xlu0 %v1182_v6 }
  0x43   : > { %247 = vadd.xlane.f32.xlu1 %v1185_v7 }
  0x46   : > { %201 = vadd.xlane.f32.xlu0 %v1190_v8 }
  0x47   : > { %217 = vadd.xlane.f32.xlu1 %v1193_v9 }
  0x4a   : > { %233 = vadd.xlane.f32.xlu0 %v1198_v10 }
  0x4b   : > { %249 = vadd.xlane.f32.xlu1 %v1201_v11 }
  0x4e   : > { %203 = vadd.xlane.f32.xlu0 %v1206_v12 }
  0x4f   : > { %219 = vadd.xlane.f32.xlu1 %v1209_v13 }
  0x52   : > { %235 = vadd.xlane.f32.xlu0 %v1214_v14 }
  0x53   : > { %251 = vadd.xlane.f32.xlu1 %v1217_v15 }
  0x56   : > { %205 = vadd.xlane.f32.xlu0 %v1222_v16 }
  0x57   : > { %221 = vadd.xlane.f32.xlu1 %v1225_v17 }
  0x5a   : > { %237 = vadd.xlane.f32.xlu0 %v1230_v18 }
  0x5b   : > { %253 = vadd.xlane.f32.xlu1 %v1233_v19 }
  0x5e   : > { %207 = vadd.xlane.f32.xlu0 %v1238_v20 }
  0x5f   : > { %223 = vadd.xlane.f32.xlu1 %v1241_v21 }
  0x62   : > { %239 = vadd.xlane.f32.xlu0 %v1246_v22 }
  0x63   : > { %255 = vadd.xlane.f32.xlu1 %v1249_v23 }
  0x66   : > { %209 = vadd.xlane.f32.xlu0 %v1254_v24 }
  0x67   : > { %225 = vadd.xlane.f32.xlu1 %v1257_v25 }
  0x6a   : > { %241 = vadd.xlane.f32.xlu0 %v1262_v26 }
  0x6b   : > { %257 = vadd.xlane.f32.xlu1 %v1265_v27 }
  0x6e   : > { %211 = vadd.xlane.f32.xlu0 %v1270_v28 }
  0x6f   : > { %227 = vadd.xlane.f32.xlu1 %v1273_v29 }
  0x72   : > { %243 = vadd.xlane.f32.xlu0 %v1278_v30 }
  0x73   : > { %259 = vadd.xlane.f32.xlu1 %v1281_v31 }
  0xbf   : > { %v198_v32 = vpop.xlane.xlu0 %197 }
  0xc0   : > { %v214_v33 = vpop.xlane.xlu1 %213  ;;  %v262_v34 = vmul.f32 0.0078125, %v198_v32 }
  0xc1   : > { %v270_v35 = vmul.f32 0.0078125, %v214_v33 }
  0xc2   : > { %v1286_v36 = vsub.f32 %v1158_v0, %v262_v34 }
  0xc3   : > { %v1289_v37 = vsub.f32 %v1161_v1, %v270_v35  ;;  %v200_v38 = vpop.xlane.xlu0 %199 }
  0xc4   : > { %v216_v39 = vpop.xlane.xlu1 %215  ;;  %v263_v40 = vmul.f32 0.0078125, %v200_v38  ;;  %v326_v41 = vmul.f32 %v1286_v36, %v1286_v36 }
  0xc5   : > { %v271_v42 = vmul.f32 0.0078125, %v216_v39  ;;  %v334_v45 = vmul.f32 %v1289_v37, %v1289_v37 }
  0xc6   : > { %v1294_v43 = vsub.f32 %v1166_v2, %v263_v40  ;;  %358 = vadd.xlane.f32.xlu0 %v326_v41 }
  0xc7   : > { %v1297_v44 = vsub.f32 %v1169_v3, %v271_v42  ;;  %v230_v46 = vpop.xlane.xlu0 %229 }
  0xc8   : > { %v232_v47 = vpop.xlane.xlu1 %231  ;;  %v278_v48 = vmul.f32 0.0078125, %v230_v46  ;;  %v327_v49 = vmul.f32 %v1294_v43, %v1294_v43 }
  0xc9   : > { %v279_v50 = vmul.f32 0.0078125, %v232_v47  ;;  %v335_v53 = vmul.f32 %v1297_v44, %v1297_v44 }
  0xca   : > { %v1304_v51 = vsub.f32 %v1174_v4, %v278_v48  ;;  %374 = vadd.xlane.f32.xlu0 %v334_v45  ;;  %360 = vadd.xlane.f32.xlu1 %v327_v49 }
  0xcb   : > { %v1307_v52 = vsub.f32 %v1177_v5, %v279_v50  ;;  %v246_v54 = vpop.xlane.xlu0 %245 }
  0xcc   : > { %v248_v55 = vpop.xlane.xlu1 %247  ;;  %v286_v56 = vmul.f32 0.0078125, %v246_v54  ;;  %v342_v57 = vmul.f32 %v1304_v51, %v1304_v51 }
  0xcd   : > { %v287_v58 = vmul.f32 0.0078125, %v248_v55  ;;  %v343_v61 = vmul.f32 %v1307_v52, %v1307_v52 }
  0xce   : > { %v1314_v59 = vsub.f32 %v1182_v6, %v286_v56  ;;  %376 = vadd.xlane.f32.xlu1 %v335_v53  ;;  %390 = vadd.xlane.f32.xlu0 %v342_v57 }
  0xcf   : > { %v1317_v60 = vsub.f32 %v1185_v7, %v287_v58  ;;  %v202_v62 = vpop.xlane.xlu0 %201 }
  0xd0   : > { %v218_v63 = vpop.xlane.xlu1 %217  ;;  %v264_v0 = vmul.f32 0.0078125, %v202_v62  ;;  %v350_v1 = vmul.f32 %v1314_v59, %v1314_v59 }
  0xd1   : > { %v272_v2 = vmul.f32 0.0078125, %v218_v63  ;;  %v351_v5 = vmul.f32 %v1317_v60, %v1317_v60 }
  0xd2   : > { %v1324_v3 = vsub.f32 %v1190_v8, %v264_v0  ;;  %392 = vadd.xlane.f32.xlu1 %v343_v61  ;;  %406 = vadd.xlane.f32.xlu0 %v350_v1 }
  0xd3   : > { %v1327_v4 = vsub.f32 %v1193_v9, %v272_v2  ;;  %v234_v6 = vpop.xlane.xlu0 %233 }
  0xd4   : > { %v250_v7 = vpop.xlane.xlu1 %249  ;;  %v280_v32 = vmul.f32 0.0078125, %v234_v6  ;;  %v328_v33 = vmul.f32 %v1324_v3, %v1324_v3 }
  0xd5   : > { %v288_v34 = vmul.f32 0.0078125, %v250_v7  ;;  %v336_v9 = vmul.f32 %v1327_v4, %v1327_v4 }
  0xd6   : > { %v1334_v35 = vsub.f32 %v1198_v10, %v280_v32  ;;  %408 = vadd.xlane.f32.xlu1 %v351_v5  ;;  %362 = vadd.xlane.f32.xlu0 %v328_v33 }
  0xd7   : > { %v1337_v8 = vsub.f32 %v1201_v11, %v288_v34  ;;  %v204_v38 = vpop.xlane.xlu0 %203 }
  0xd8   : > { %v220_v39 = vpop.xlane.xlu1 %219  ;;  %v265_v40 = vmul.f32 0.0078125, %v204_v38  ;;  %v344_v41 = vmul.f32 %v1334_v35, %v1334_v35 }
  0xd9   : > { %v273_v42 = vmul.f32 0.0078125, %v220_v39  ;;  %v352_v11 = vmul.f32 %v1337_v8, %v1337_v8 }
  0xda   : > { %v1344_v45 = vsub.f32 %v1206_v12, %v265_v40  ;;  %378 = vadd.xlane.f32.xlu1 %v336_v9  ;;  %394 = vadd.xlane.f32.xlu0 %v344_v41 }
  0xdb   : > { %v1347_v10 = vsub.f32 %v1209_v13, %v273_v42  ;;  %v236_v46 = vpop.xlane.xlu0 %235 }
  0xdc   : > { %v252_v47 = vpop.xlane.xlu1 %251  ;;  %v281_v48 = vmul.f32 0.0078125, %v236_v46  ;;  %v329_v49 = vmul.f32 %v1344_v45, %v1344_v45 }
  0xdd   : > { %v289_v50 = vmul.f32 0.0078125, %v252_v47  ;;  %v337_v13 = vmul.f32 %v1347_v10, %v1347_v10 }
  0xde   : > { %v1354_v53 = vsub.f32 %v1214_v14, %v281_v48  ;;  %410 = vadd.xlane.f32.xlu1 %v352_v11  ;;  %364 = vadd.xlane.f32.xlu0 %v329_v49 }
  0xdf   : > { %v1357_v12 = vsub.f32 %v1217_v15, %v289_v50  ;;  %v206_v54 = vpop.xlane.xlu0 %205 }
  0xe0   : > { %v222_v55 = vpop.xlane.xlu1 %221  ;;  %v266_v56 = vmul.f32 0.0078125, %v206_v54  ;;  %v345_v57 = vmul.f32 %v1354_v53, %v1354_v53 }
  0xe1   : > { %v274_v58 = vmul.f32 0.0078125, %v222_v55  ;;  %v353_v15 = vmul.f32 %v1357_v12, %v1357_v12 }
  0xe2   : > { %v1364_v61 = vsub.f32 %v1222_v16, %v266_v56  ;;  %380 = vadd.xlane.f32.xlu1 %v337_v13  ;;  %396 = vadd.xlane.f32.xlu0 %v345_v57 }
  0xe3   : > { %v1367_v14 = vsub.f32 %v1225_v17, %v274_v58  ;;  %v238_v62 = vpop.xlane.xlu0 %237 }
  0xe4   : > { %v254_v63 = vpop.xlane.xlu1 %253  ;;  %v282_v0 = vmul.f32 0.0078125, %v238_v62  ;;  %v330_v1 = vmul.f32 %v1364_v61, %v1364_v61 }
  0xe5   : > { %v290_v2 = vmul.f32 0.0078125, %v254_v63  ;;  %v338_v17 = vmul.f32 %v1367_v14, %v1367_v14 }
  0xe6   : > { %v1374_v5 = vsub.f32 %v1230_v18, %v282_v0  ;;  %412 = vadd.xlane.f32.xlu1 %v353_v15  ;;  %366 = vadd.xlane.f32.xlu0 %v330_v1 }
  0xe7   : > { %v1377_v16 = vsub.f32 %v1233_v19, %v290_v2  ;;  %v208_v6 = vpop.xlane.xlu0 %207 }
  0xe8   : > { %v224_v7 = vpop.xlane.xlu1 %223  ;;  %v267_v32 = vmul.f32 0.0078125, %v208_v6  ;;  %v346_v33 = vmul.f32 %v1374_v5, %v1374_v5 }
  0xe9   : > { %v275_v34 = vmul.f32 0.0078125, %v224_v7  ;;  %v354_v19 = vmul.f32 %v1377_v16, %v1377_v16 }
  0xea   : > { %v1384_v9 = vsub.f32 %v1238_v20, %v267_v32  ;;  %382 = vadd.xlane.f32.xlu1 %v338_v17  ;;  %398 = vadd.xlane.f32.xlu0 %v346_v33 }
  0xeb   : > { %v1387_v18 = vsub.f32 %v1241_v21, %v275_v34  ;;  %v240_v38 = vpop.xlane.xlu0 %239 }
  0xec   : > { %v256_v39 = vpop.xlane.xlu1 %255  ;;  %v283_v40 = vmul.f32 0.0078125, %v240_v38  ;;  %v331_v41 = vmul.f32 %v1384_v9, %v1384_v9 }
  0xed   : > { %v291_v42 = vmul.f32 0.0078125, %v256_v39  ;;  %v339_v21 = vmul.f32 %v1387_v18, %v1387_v18 }
  0xee   : > { %v1394_v11 = vsub.f32 %v1246_v22, %v283_v40  ;;  %414 = vadd.xlane.f32.xlu1 %v354_v19  ;;  %368 = vadd.xlane.f32.xlu0 %v331_v41 }
  0xef   : > { %v1397_v20 = vsub.f32 %v1249_v23, %v291_v42  ;;  %v210_v46 = vpop.xlane.xlu0 %209 }
  0xf0   : > { %v226_v47 = vpop.xlane.xlu1 %225  ;;  %v268_v48 = vmul.f32 0.0078125, %v210_v46  ;;  %v347_v49 = vmul.f32 %v1394_v11, %v1394_v11 }
  0xf1   : > { %v276_v50 = vmul.f32 0.0078125, %v226_v47  ;;  %v355_v23 = vmul.f32 %v1397_v20, %v1397_v20 }
  0xf2   : > { %v1404_v13 = vsub.f32 %v1254_v24, %v268_v48  ;;  %384 = vadd.xlane.f32.xlu1 %v339_v21  ;;  %400 = vadd.xlane.f32.xlu0 %v347_v49 }
  0xf3   : > { %v1407_v22 = vsub.f32 %v1257_v25, %v276_v50  ;;  %v242_v54 = vpop.xlane.xlu0 %241 }
  0xf4   : > { %v258_v55 = vpop.xlane.xlu1 %257  ;;  %v284_v56 = vmul.f32 0.0078125, %v242_v54  ;;  %v332_v57 = vmul.f32 %v1404_v13, %v1404_v13 }
  0xf5   : > { %v292_v58 = vmul.f32 0.0078125, %v258_v55  ;;  %v340_v25 = vmul.f32 %v1407_v22, %v1407_v22 }
  0xf6   : > { %v1414_v15 = vsub.f32 %v1262_v26, %v284_v56  ;;  %416 = vadd.xlane.f32.xlu1 %v355_v23  ;;  %370 = vadd.xlane.f32.xlu0 %v332_v57 }
  0xf7   : > { %v1417_v24 = vsub.f32 %v1265_v27, %v292_v58  ;;  %v212_v62 = vpop.xlane.xlu0 %211 }
  0xf8   : > { %v228_v63 = vpop.xlane.xlu1 %227  ;;  %v269_v0 = vmul.f32 0.0078125, %v212_v62  ;;  %v348_v1 = vmul.f32 %v1414_v15, %v1414_v15 }
  0xf9   : > { %v277_v2 = vmul.f32 0.0078125, %v228_v63  ;;  %v356_v27 = vmul.f32 %v1417_v24, %v1417_v24 }
  0xfa   : > { %v1424_v17 = vsub.f32 %v1270_v28, %v269_v0  ;;  %386 = vadd.xlane.f32.xlu1 %v340_v25  ;;  %402 = vadd.xlane.f32.xlu0 %v348_v1 }
  0xfb   : > { %v1427_v26 = vsub.f32 %v1273_v29, %v277_v2  ;;  %v244_v6 = vpop.xlane.xlu0 %243 }
  0xfc   : > { %v260_v7 = vpop.xlane.xlu1 %259  ;;  %v285_v32 = vmul.f32 0.0078125, %v244_v6  ;;  %v333_v33 = vmul.f32 %v1424_v17, %v1424_v17 }
  0xfd   : > { %v293_v34 = vmul.f32 0.0078125, %v260_v7  ;;  %v341_v29 = vmul.f32 %v1427_v26, %v1427_v26 }
  0xfe   : > { %v1434_v19 = vsub.f32 %v1278_v30, %v285_v32  ;;  %418 = vadd.xlane.f32.xlu1 %v356_v27  ;;  %372 = vadd.xlane.f32.xlu0 %v333_v33 }
  0xff   : > { %v1437_v28 = vsub.f32 %v1281_v31, %v293_v34 }
 0x100   : > { %v349_v38 = vmul.f32 %v1434_v19, %v1434_v19 }
 0x101   : > { %v357_v39 = vmul.f32 %v1437_v28, %v1437_v28 }
 0x102   : > { %388 = vadd.xlane.f32.xlu1 %v341_v29  ;;  %404 = vadd.xlane.f32.xlu0 %v349_v38 }
 0x106   : > { %420 = vadd.xlane.f32.xlu1 %v357_v39 }
 0x14f   : > { %v359_v40 = vpop.xlane.xlu0 %358 }
 0x150   : > { %v422_v55 = vmul.f32 0.0078125, %v359_v40 }
 0x152   : > { %v454_v63 = vadd.f32 1e-05, %v422_v55 }
 0x153   : > { %v361_v30 = vpop.xlane.xlu1 %360  ;;  %v375_v41 = vpop.xlane.xlu0 %374 }
 0x154   : > { %v423_v56 = vmul.f32 0.0078125, %v361_v30  ;;  %v430_v57 = vmul.f32 0.0078125, %v375_v41  ;;  %869 = vrsqrt.f32 %v454_v63 }
 0x156   : > { %v455_v1 = vadd.f32 1e-05, %v423_v56  ;;  %v462_v27 = vadd.f32 1e-05, %v430_v57 }
 0x157   : > { %v377_v42 = vpop.xlane.xlu1 %376  ;;  %v391_v21 = vpop.xlane.xlu0 %390 }
 0x158   : > { %v431_v62 = vmul.f32 0.0078125, %v377_v42  ;;  %v438_v0 = vmul.f32 0.0078125, %v391_v21  ;;  %871 = vrsqrt.f32 %v455_v1 }
 0x159   : > { %873 = vrsqrt.f32 %v462_v27 }
 0x15a   : > { %v463_v33 = vadd.f32 1e-05, %v431_v62  ;;  %v470_v29 = vadd.f32 1e-05, %v438_v0 }
 0x15b   : > { %v393_v46 = vpop.xlane.xlu1 %392  ;;  %v407_v31 = vpop.xlane.xlu0 %406 }
 0x15c   : > { %v439_v2 = vmul.f32 0.0078125, %v393_v46  ;;  %v446_v6 = vmul.f32 0.0078125, %v407_v31  ;;  %875 = vrsqrt.f32 %v463_v33 }
 0x15d   : > { %877 = vrsqrt.f32 %v470_v29 }
 0x15e   : > { %v471_v39 = vadd.f32 1e-05, %v439_v2  ;;  %v478_v30 = vadd.f32 1e-05, %v446_v6 }
 0x15f   : > { %v409_v47 = vpop.xlane.xlu1 %408  ;;  %v363_v48 = vpop.xlane.xlu0 %362 }
 0x160   : > { %v447_v34 = vmul.f32 0.0078125, %v409_v47  ;;  %v424_v38 = vmul.f32 0.0078125, %v363_v48  ;;  %879 = vrsqrt.f32 %v471_v39 }
 0x161   : > { %881 = vrsqrt.f32 %v478_v30 }
 0x162   : > { %v479_v21 = vadd.f32 1e-05, %v447_v34  ;;  %v456_v31 = vadd.f32 1e-05, %v424_v38  ;;  %v1445_v38 = vpop.eup %869 }
 0x163   : > { %v379_v49 = vpop.xlane.xlu1 %378  ;;  %v395_v50 = vpop.xlane.xlu0 %394 }
 0x164   : > { %v432_v40 = vmul.f32 0.0078125, %v379_v49  ;;  %v440_v41 = vmul.f32 0.0078125, %v395_v50  ;;  %883 = vrsqrt.f32 %v479_v21 }
 0x165   : > { %885 = vrsqrt.f32 %v456_v31 }
 0x166   : > { %v464_v57 = vadd.f32 1e-05, %v432_v40  ;;  %v472_v62 = vadd.f32 1e-05, %v440_v41  ;;  %v872_v40 = vpop.eup %871 }
 0x167   : > { %v411_v23 = vpop.xlane.xlu1 %410  ;;  %v365_v54 = vpop.xlane.xlu0 %364 }
 0x168   : > { %v448_v46 = vmul.f32 0.0078125, %v411_v23  ;;  %v425_v56 = vmul.f32 0.0078125, %v365_v54  ;;  %887 = vrsqrt.f32 %v464_v57 }
 0x169   : > { %889 = vrsqrt.f32 %v472_v62 }
 0x16a   : > { %v480_v49 = vadd.f32 1e-05, %v448_v46  ;;  %v457_v50 = vadd.f32 1e-05, %v425_v56 }
 0x16b   : > { %v381_v58 = vpop.xlane.xlu1 %380  ;;  %v397_v25 = vpop.xlane.xlu0 %396 }
 0x16c   : > { %v433_v47 = vmul.f32 0.0078125, %v381_v58  ;;  %v441_v48 = vmul.f32 0.0078125, %v397_v25  ;;  %891 = vrsqrt.f32 %v480_v49 }
 0x16d   : > { %893 = vrsqrt.f32 %v457_v50 }
 0x16e   : > { %v465_v27 = vadd.f32 1e-05, %v433_v47  ;;  %v473_v6 = vadd.f32 1e-05, %v441_v48 }
 0x16f   : > { %v413_v7 = vpop.xlane.xlu1 %412  ;;  %v367_v32 = vpop.xlane.xlu0 %366 }
 0x170   : > { %v449_v1 = vmul.f32 0.0078125, %v413_v7  ;;  %v426_v2 = vmul.f32 0.0078125, %v367_v32  ;;  %895 = vrsqrt.f32 %v465_v27 }
 0x171   : > { %897 = vrsqrt.f32 %v473_v6 }
 0x172   : > { %v481_v58 = vadd.f32 1e-05, %v449_v1  ;;  %v458_v25 = vadd.f32 1e-05, %v426_v2 }
 0x173   : > { %v383_v42 = vpop.xlane.xlu1 %382  ;;  %v399_v55 = vpop.xlane.xlu0 %398 }
 0x174   : > { %v434_v23 = vmul.f32 0.0078125, %v383_v42  ;;  %v442_v54 = vmul.f32 0.0078125, %v399_v55  ;;  %v1447_v42 = vpop.eup %873  ;;  %899 = vrsqrt.f32 %v481_v58 }
 0x175   : > { %v876_v46 = vpop.eup %875  ;;  %901 = vrsqrt.f32 %v458_v25 }
 0x176   : > { %v466_v7 = vadd.f32 1e-05, %v434_v23  ;;  %v474_v32 = vadd.f32 1e-05, %v442_v54  ;;  %v1449_v57 = vpop.eup %877 }
 0x177   : > { %v415_v63 = vpop.xlane.xlu1 %414  ;;  %v369_v0 = vpop.xlane.xlu0 %368 }
 0x178   : > { %v427_v29 = vmul.f32 0.0078125, %v369_v0  ;;  %v450_v39 = vmul.f32 0.0078125, %v415_v63  ;;  %903 = vrsqrt.f32 %v466_v7  ;;  %v880_v62 = vpop.eup %879 }
 0x179   : > { %905 = vrsqrt.f32 %v474_v32  ;;  %v1451_v49 = vpop.eup %881 }
 0x17a   : > { %v459_v31 = vadd.f32 1e-05, %v427_v29  ;;  %v482_v47 = vadd.f32 1e-05, %v450_v39  ;;  %v884_v23 = vpop.eup %883 }
 0x17b   : > { %v385_v33 = vpop.xlane.xlu1 %384  ;;  %v401_v34 = vpop.xlane.xlu0 %400 }
 0x17c   : > { %v435_v55 = vmul.f32 0.0078125, %v385_v33  ;;  %v443_v56 = vmul.f32 0.0078125, %v401_v34  ;;  %907 = vrsqrt.f32 %v459_v31  ;;  %v886_v54 = vpop.eup %885 }
 0x17d   : > { %909 = vrsqrt.f32 %v482_v47  ;;  %v888_v34 = vpop.eup %887 }
 0x17e   : > { %v467_v1 = vadd.f32 1e-05, %v435_v55  ;;  %v475_v6 = vadd.f32 1e-05, %v443_v56  ;;  %v890_v7 = vpop.eup %889 }
 0x17f   : > { %v417_v30 = vpop.xlane.xlu1 %416  ;;  %v371_v41 = vpop.xlane.xlu0 %370 }
 0x180   : > { %v428_v21 = vmul.f32 0.0078125, %v371_v41  ;;  %v451_v50 = vmul.f32 0.0078125, %v417_v30  ;;  %v892_v55 = vpop.eup %891 }
 0x181   : > { %v894_v30 = vpop.eup %893 }
 0x182   : > { %v460_v48 = vadd.f32 1e-05, %v428_v21  ;;  %v483_v39 = vadd.f32 1e-05, %v451_v50  ;;  %v896_v56 = vpop.eup %895 }
 0x183   : > { %v387_v63 = vpop.xlane.xlu1 %386  ;;  %v403_v0 = vpop.xlane.xlu0 %402 }
 0x184   : > { %v436_v2 = vmul.f32 0.0078125, %v387_v63  ;;  %v444_v27 = vmul.f32 0.0078125, %v403_v0  ;;  %911 = vrsqrt.f32 %v460_v48  ;;  %v898_v0 = vpop.eup %897 }
 0x185   : > { %913 = vrsqrt.f32 %v467_v1  ;;  %v1454_v1 = vmul.f32 %v872_v40, %v1294_v43 }
 0x186   : > { %v468_v33 = vadd.f32 1e-05, %v436_v2  ;;  %v476_v58 = vadd.f32 1e-05, %v444_v27  ;;  %915 = vrsqrt.f32 %v475_v6  ;;  %v900_v27 = vpop.eup %899 }
 0x187   : > { %v419_v25 = vpop.xlane.xlu1 %418  ;;  %v373_v29 = vpop.xlane.xlu0 %372 }
 0x188   : > { %v452_v32 = vmul.f32 0.0078125, %v419_v25  ;;  %v429_v41 = vmul.f32 0.0078125, %v373_v29  ;;  %917 = vrsqrt.f32 %v468_v33  ;;  %v902_v50 = vpop.eup %901  ;;  %v1458_v29 = vmul.f32 %v1445_v38, %v1286_v36 }
 0x189   : > { %919 = vrsqrt.f32 %v476_v58  ;;  %v904_v33 = vpop.eup %903  ;;  %v1461_v58 = vmul.f32 %v886_v54, %v1324_v3  ;;  %v1476_v3 = vmul.f32 %v1447_v42, %v1289_v37  ;;  %v1483_v54 = vmul.f32 %v1449_v57, %v1304_v51 }
 0x18a   : > { %v484_v21 = vadd.f32 1e-05, %v452_v32  ;;  %v461_v31 = vadd.f32 1e-05, %v429_v41  ;;  %921 = vrsqrt.f32 %v483_v39  ;;  %v906_v32 = vpop.eup %905  ;;  %v1464_v41 = vmul.f32 %v876_v46, %v1297_v44 }
 0x18b   : > { %v389_v47 = vpop.xlane.xlu1 %388  ;;  %v405_v63 = vpop.xlane.xlu0 %404  ;;  %v550_v40 = vadd.f32 %v1454_v1, %v1458_v29  ;;  %v1479_v44 = vmul.f32 %v888_v34, %v1327_v4  ;;  %v1495_v4 = vmul.f32 %v884_v23, %v1317_v60  ;;  %v1498_v42 = vmul.f32 %v896_v56, %v1347_v10 }
 0x18c   : > { %v437_v48 = vmul.f32 0.0078125, %v389_v47  ;;  %v445_v2 = vmul.f32 0.0078125, %v405_v63  ;;  %923 = vrsqrt.f32 %v461_v31  ;;  %v1472_v31 = vmul.f32 %v894_v30, %v1344_v45  ;;  %v908_v36 = vpop.eup %907 }
 0x18d   : > { %925 = vrsqrt.f32 %v484_v21  ;;  %v1469_v21 = vmul.f32 %v880_v62, %v1307_v52  ;;  %v910_v46 = vpop.eup %909  ;;  %v551_v52 = vadd.f32 %v550_v40, %v1461_v58  ;;  %v1487_v45 = vmul.f32 %v890_v7, %v1334_v35 }
 0x18e   : > { %v469_v6 = vadd.f32 1e-05, %v437_v48  ;;  %v477_v25 = vadd.f32 1e-05, %v445_v2  ;;  %v1490_v62 = vmul.f32 %v902_v50, %v1364_v61  ;;  %v563_v37 = vadd.f32 %v1464_v41, %v1476_v3 }
 0x18f   : > { %v421_v39 = vpop.xlane.xlu1 %420  ;;  %v576_v57 = vadd.f32 %v1469_v21, %v1483_v54  ;;  %v552_v35 = vadd.f32 %v551_v52, %v1472_v31  ;;  %v1504_v61 = vmul.f32 %v898_v0, %v1354_v53  ;;  %v1507_v34 = vmul.f32 %v908_v36, %v1384_v9 }
 0x190   : > { %927 = vrsqrt.f32 %v469_v6  ;;  %v453_v43 = vmul.f32 0.0078125, %v421_v39  ;;  %v1511_v60 = vmul.f32 %v1451_v49, %v1314_v59  ;;  %v564_v10 = vadd.f32 %v563_v37, %v1479_v44 }
 0x191   : > { %929 = vrsqrt.f32 %v477_v25  ;;  %v912_v30 = vpop.eup %911  ;;  %v1515_v23 = vmul.f32 %v892_v55, %v1337_v8  ;;  %v1518_v56 = vmul.f32 %v904_v33, %v1367_v14  ;;  %v577_v53 = vadd.f32 %v576_v57, %v1487_v45 }
 0x192   : > { %v485_v38 = vadd.f32 1e-05, %v453_v43  ;;  %v914_v51 = vpop.eup %913  ;;  %v553_v63 = vadd.f32 %v552_v35, %v1490_v62  ;;  %v1523_v9 = vmul.f32 %v906_v32, %v1374_v5  ;;  %v1526_v0 = vmul.f32 %v912_v30, %v1404_v13 }
 0x193   : > { %v916_v7 = vpop.eup %915  ;;  %v589_v49 = vadd.f32 %v1495_v4, %v1511_v60  ;;  %v565_v8 = vadd.f32 %v564_v10, %v1498_v42  ;;  %v1532_v14 = vmul.f32 %v900_v27, %v1357_v12  ;;  %v1535_v55 = vmul.f32 %v914_v51, %v1387_v18 }
 0x194   : > { %931 = vrsqrt.f32 %v485_v38  ;;  %v578_v2 = vadd.f32 %v577_v53, %v1504_v61  ;;  %v554_v5 = vadd.f32 %v553_v63, %v1507_v34  ;;  %v1540_v13 = vmul.f32 %v916_v7, %v1394_v11 }
 0x195   : > { %v918_v47 = vpop.eup %917  ;;  %v590_v6 = vadd.f32 %v589_v49, %v1515_v23  ;;  %v566_v25 = vadd.f32 %v565_v8, %v1518_v56  ;;  %v1545_v33 = vmul.f32 %v910_v46, %v1377_v16 }
 0x196   : > { %v920_v59 = vpop.eup %919  ;;  %v1548_v12 = vmul.f32 %v918_v47, %v1407_v22  ;;  %v579_v27 = vadd.f32 %v578_v2, %v1523_v9  ;;  %v555_v39 = vadd.f32 %v554_v5, %v1526_v0 }
 0x197   : > { %v922_v48 = vpop.eup %921  ;;  %v1553_v32 = vmul.f32 %v920_v59, %v1414_v15  ;;  %v591_v43 = vadd.f32 %v590_v6, %v1532_v14  ;;  %v567_v40 = vadd.f32 %v566_v25, %v1535_v55 }
 0x198   : > { %v1559_v16 = vmul.f32 %v922_v48, %v1397_v20  ;;  %v580_v22 = vadd.f32 %v579_v27, %v1540_v13 }
 0x199   : > { %v924_v50 = vpop.eup %923  ;;  %v592_v52 = vadd.f32 %v591_v43, %v1545_v33  ;;  %v568_v30 = vadd.f32 %v567_v40, %v1548_v12 }
 0x19a   : > { %v926_v18 = vpop.eup %925  ;;  %v525_v11 = vmul.f32 %v924_v50, %v1424_v17  ;;  %v581_v37 = vadd.f32 %v580_v22, %v1553_v32 }
 0x19b   : > { %v1565_v15 = vmul.f32 %v926_v18, %v1417_v24  ;;  %v593_v57 = vadd.f32 %v592_v52, %v1559_v16 }
 0x19c   : > { %v556_v38 = vadd.f32 %v555_v39, %v525_v11 }
 0x19d   : > { %v928_v36 = vpop.eup %927  ;;  %v594_v24 = vadd.f32 %v593_v57, %v1565_v15 }
 0x19e   : > { %v930_v46 = vpop.eup %929  ;;  %v1568_v17 = vmul.f32 %v928_v36, %v1427_v26  ;;  %v557_v51 = vrot.slane %v556_v38, 4 }
 0x19f   : > { %v1572_v20 = vmul.f32 %v930_v46, %v1434_v19 }
 0x1a0   : > { %v569_v35 = vadd.f32 %v568_v30, %v1568_v17  ;;  %v558_v10 = vadd.f32 %v557_v51, %v556_v38 }
 0x1a1   : > { %v932_v7 = vpop.eup %931  ;;  %v582_v47 = vadd.f32 %v581_v37, %v1572_v20 }
 0x1a2   : > { %v570_v53 = vrot.slane %v569_v35, 4  ;;  %v1579_v26 = vmul.f32 %v932_v7, %v1437_v28  ;;  %v559_v63 = vrot.slane %v558_v10, 2  ;;  %v1585_v28 = vld [vmem:[%s1737_s1] ss:$0 sm:$0xff] }
 0x1a3   : > { %v583_v59 = vrot.slane %v582_v47, 4 }
 0x1a4   : > { %v571_v49 = vadd.f32 %v570_v53, %v569_v35  ;;  %v595_v19 = vadd.f32 %v594_v24, %v1579_v26  ;;  %v560_v8 = vadd.f32 %v559_v63, %v558_v10 }
 0x1a5   : > { %v584_v48 = vadd.f32 %v583_v59, %v582_v47 }
 0x1a6   : > { %v572_v2 = vrot.slane %v571_v49, 2  ;;  %v596_v5 = vrot.slane %v595_v19, 4  ;;  %v561_v50 = vrot.slane %v560_v8, 1 }
 0x1a7   : > { %v585_v6 = vrot.slane %v584_v48, 2 }
 0x1a8   : > { %v573_v25 = vadd.f32 %v572_v2, %v571_v49  ;;  %v597_v18 = vadd.f32 %v596_v5, %v595_v19  ;;  %v562_v27 = vadd.f32 %v561_v50, %v560_v8 }
 0x1a9   : > { %v586_v39 = vadd.f32 %v585_v6, %v584_v48 }
 0x1aa   : > { %v574_v43 = vrot.slane %v573_v25, 1  ;;  %v598_v40 = vrot.slane %v597_v18, 2  ;;  %v603_v36 = vmul.f32 0.015625, %v562_v27 }
 0x1ab   : > { %v587_v38 = vrot.slane %v586_v39, 1 }
 0x1ac   : > { %v575_v22 = vadd.f32 %v574_v43, %v573_v25  ;;  %v599_v46 = vadd.f32 %v598_v40, %v597_v18  ;;  %v607_v52 = vsub.f32 %v1458_v29, %v603_v36  ;;  %v608_v30 = vsub.f32 %v1454_v1, %v603_v36 }
 0x1ad   : > { %v609_v37 = vsub.f32 %v1461_v58, %v603_v36  ;;  %v610_v51 = vsub.f32 %v1472_v31, %v603_v36  ;;  %v611_v57 = vsub.f32 %v1490_v62, %v603_v36  ;;  %v612_v35 = vsub.f32 %v1507_v34, %v603_v36 }
 0x1ae   : > { %v613_v7 = vsub.f32 %v1526_v0, %v603_v36  ;;  %v614_v10 = vsub.f32 %v525_v11, %v603_v36  ;;  %v646_v47 = vmul.f32 %v1585_v28, %v607_v52  ;;  %v647_v24 = vmul.f32 %v1585_v28, %v608_v30 }
 0x1af   : > { %v648_v29 = vmul.f32 %v1585_v28, %v609_v37  ;;  %v649_v53 = vmul.f32 %v1585_v28, %v610_v51  ;;  %v650_v1 = vmul.f32 %v1585_v28, %v611_v57  ;;  %v651_v58 = vmul.f32 %v1585_v28, %v612_v35 }
 0x1b0   : > { %v652_v31 = vmul.f32 %v1585_v28, %v613_v7  ;;  %v653_v62 = vmul.f32 %v1585_v28, %v614_v10  ;;  %678 = vst [vmem:[%s1604_s30] sm:$0xff] %v646_v47  ;;  %679 = vst [vmem:[%s1604_s30 + $0x8] sm:$0xff] %v647_v24  ;;  %v604_v34 = vmul.f32 0.015625, %v575_v22  ;;  %v588_v0 = vadd.f32 %v587_v38, %v586_v39 }
 0x1b1   : > { %680 = vst [vmem:[%s1604_s30 + $0x10] sm:$0xff] %v648_v29  ;;  %681 = vst [vmem:[%s1604_s30 + $0x18] sm:$0xff] %v649_v53  ;;  %v600_v11 = vrot.slane %v599_v46, 1 }
 0x1b2   : > { %682 = vst [vmem:[%s1604_s30 + $0x20] sm:$0xff] %v650_v1  ;;  %683 = vst [vmem:[%s1604_s30 + $0x28] sm:$0xff] %v651_v58  ;;  %v615_v63 = vsub.f32 %v1476_v3, %v604_v34  ;;  %v616_v59 = vsub.f32 %v1464_v41, %v604_v34  ;;  %v617_v49 = vsub.f32 %v1479_v44, %v604_v34 }
 0x1b3   : > { %684 = vst [vmem:[%s1604_s30 + $0x30] sm:$0xff] %v652_v31  ;;  %685 = vst [vmem:[%s1604_s30 + $0x38] sm:$0xff] %v653_v62  ;;  %v618_v19 = vsub.f32 %v1498_v42, %v604_v34  ;;  %v619_v8 = vsub.f32 %v1518_v56, %v604_v34  ;;  %v620_v48 = vsub.f32 %v1535_v55, %v604_v34 }
 0x1b4   : > { %v621_v2 = vsub.f32 %v1548_v12, %v604_v34  ;;  %v622_v3 = vsub.f32 %v1568_v17, %v604_v34  ;;  %v654_v41 = vmul.f32 %v1585_v28, %v615_v63  ;;  %v655_v44 = vmul.f32 %v1585_v28, %v616_v59 }
 0x1b5   : > { %v656_v5 = vmul.f32 %v1585_v28, %v617_v49  ;;  %v657_v42 = vmul.f32 %v1585_v28, %v618_v19  ;;  %v658_v56 = vmul.f32 %v1585_v28, %v619_v8  ;;  %v659_v55 = vmul.f32 %v1585_v28, %v620_v48 }
 0x1b6   : > { %v660_v50 = vmul.f32 %v1585_v28, %v621_v2  ;;  %v661_v12 = vmul.f32 %v1585_v28, %v622_v3  ;;  %686 = vst [vmem:[%s1604_s30 + $0x40] sm:$0xff] %v654_v41  ;;  %687 = vst [vmem:[%s1604_s30 + $0x48] sm:$0xff] %v655_v44  ;;  %v605_v17 = vmul.f32 0.015625, %v588_v0  ;;  %v601_v6 = vadd.f32 %v600_v11, %v599_v46 }
 0x1b7   : > { %688 = vst [vmem:[%s1604_s30 + $0x50] sm:$0xff] %v656_v5  ;;  %689 = vst [vmem:[%s1604_s30 + $0x58] sm:$0xff] %v657_v42 }
 0x1b8   : > { %690 = vst [vmem:[%s1604_s30 + $0x60] sm:$0xff] %v658_v56  ;;  %691 = vst [vmem:[%s1604_s30 + $0x68] sm:$0xff] %v659_v55  ;;  %v623_v25 = vsub.f32 %v1483_v54, %v605_v17  ;;  %v624_v18 = vsub.f32 %v1469_v21, %v605_v17  ;;  %v625_v27 = vsub.f32 %v1487_v45, %v605_v17  ;;  %v606_v38 = vmul.f32 0.015625, %v601_v6 }
 0x1b9   : > { %692 = vst [vmem:[%s1604_s30 + $0x70] sm:$0xff] %v660_v50  ;;  %693 = vst [vmem:[%s1604_s30 + $0x78] sm:$0xff] %v661_v12  ;;  %v626_v39 = vsub.f32 %v1504_v61, %v605_v17  ;;  %v627_v43 = vsub.f32 %v1523_v9, %v605_v17  ;;  %v628_v40 = vsub.f32 %v1540_v13, %v605_v17 }
 0x1ba   : > { %v629_v36 = vsub.f32 %v1553_v32, %v605_v17  ;;  %v630_v54 = vsub.f32 %v1572_v20, %v605_v17  ;;  %v662_v21 = vmul.f32 %v1585_v28, %v623_v25  ;;  %v663_v45 = vmul.f32 %v1585_v28, %v624_v18 }
 0x1bb   : > { %v664_v61 = vmul.f32 %v1585_v28, %v625_v27  ;;  %v665_v9 = vmul.f32 %v1585_v28, %v626_v39  ;;  %v666_v13 = vmul.f32 %v1585_v28, %v627_v43  ;;  %v667_v22 = vmul.f32 %v1585_v28, %v628_v40 }
 0x1bc   : > { %v668_v32 = vmul.f32 %v1585_v28, %v629_v36  ;;  %v669_v20 = vmul.f32 %v1585_v28, %v630_v54  ;;  %694 = vst [vmem:[%s1604_s30 + $0x80] sm:$0xff] %v662_v21  ;;  %695 = vst [vmem:[%s1604_s30 + $0x88] sm:$0xff] %v663_v45  ;;  %v631_v46 = vsub.f32 %v1511_v60, %v606_v38 }
 0x1bd   : > { %696 = vst [vmem:[%s1604_s30 + $0x90] sm:$0xff] %v664_v61  ;;  %697 = vst [vmem:[%s1604_s30 + $0x98] sm:$0xff] %v665_v9  ;;  %v632_v52 = vsub.f32 %v1495_v4, %v606_v38  ;;  %v633_v30 = vsub.f32 %v1515_v23, %v606_v38  ;;  %v634_v37 = vsub.f32 %v1532_v14, %v606_v38 }
 0x1be   : > { %698 = vst [vmem:[%s1604_s30 + $0xa0] sm:$0xff] %v666_v13  ;;  %699 = vst [vmem:[%s1604_s30 + $0xa8] sm:$0xff] %v667_v22  ;;  %v635_v51 = vsub.f32 %v1545_v33, %v606_v38  ;;  %v636_v57 = vsub.f32 %v1559_v16, %v606_v38  ;;  %v637_v35 = vsub.f32 %v1565_v15, %v606_v38 }
 0x1bf   : > { %700 = vst [vmem:[%s1604_s30 + $0xb0] sm:$0xff] %v668_v32  ;;  %701 = vst [vmem:[%s1604_s30 + $0xb8] sm:$0xff] %v669_v20  ;;  %v638_v7 = vsub.f32 %v1579_v26, %v606_v38  ;;  %v670_v4 = vmul.f32 %v1585_v28, %v631_v46  ;;  %v671_v60 = vmul.f32 %v1585_v28, %v632_v52 }
 0x1c0   : > { %v672_v23 = vmul.f32 %v1585_v28, %v633_v30  ;;  %v673_v14 = vmul.f32 %v1585_v28, %v634_v37  ;;  %v674_v33 = vmul.f32 %v1585_v28, %v635_v51  ;;  %v675_v16 = vmul.f32 %v1585_v28, %v636_v57 }
 0x1c1   : > { %v676_v15 = vmul.f32 %v1585_v28, %v637_v35  ;;  %v677_v26 = vmul.f32 %v1585_v28, %v638_v7  ;;  %702 = vst [vmem:[%s1604_s30 + $0xc0] sm:$0xff] %v670_v4  ;;  %703 = vst [vmem:[%s1604_s30 + $0xc8] sm:$0xff] %v671_v60 }
 0x1c2   : > { %704 = vst [vmem:[%s1604_s30 + $0xd0] sm:$0xff] %v672_v23  ;;  %705 = vst [vmem:[%s1604_s30 + $0xd8] sm:$0xff] %v673_v14 }
 0x1c3   : > { %706 = vst [vmem:[%s1604_s30 + $0xe0] sm:$0xff] %v674_v33  ;;  %707 = vst [vmem:[%s1604_s30 + $0xe8] sm:$0xff] %v675_v16 }
 0x1c4   : > { %708 = vst [vmem:[%s1604_s30 + $0xf0] sm:$0xff] %v676_v15  ;;  %709 = vst [vmem:[%s1604_s30 + $0xf8] sm:$0xff] %v677_v26 }
 0x1c5   : > { %974 = shalt.err (!%p971_p10)
}
 0x1c6   : > { %s975_s24 = scalar_lea.hbm %s1679_s8, 4096  ;;  %s979_s29 = scalar_lea.hbm %s1738_s2, 8192 }
 0x1c7   : > { %p976_p0 = scmp.ne.s32.totalorder %s1679_s8, %s975_s24  ;;  %p980_p1 = scmp.lt.s32.totalorder %s1679_s8, %s1738_s2 }
 0x1c8   : > { %p981_p3 = scmp.lt.s32.totalorder %s979_s29, %s975_s24 }
 0x1c9   : > { %p977_p2 = pnand %p976_p0, %p1747_p12 }
 0x1ca   : > { %p982_p6 = por %p981_p3, %p980_p1 }
 0x1cb   : > { %p978_p9 = pneg %p977_p2 }
 0x1cd   : > { %p983_p11 = pnand %p982_p6, %p978_p9 }
 0x1cf   : > { %986 = shalt.err (!%p983_p11)
}
 0x1d0   : > { %s1031_s20 = smov 128   ;;  %s1032_s28 = smov 8  }
 0x1d1   : > { %821 = dma.vmem_to_hbm [thread:$0]  (%p1747_p12), %s1681_s4, 4096, %s1679_s8, %s711_s14, %s1031_s20, %s1031_s20, %s1032_s28  }
 0x1d2 PF: > { %s740_s30 = sand.u32 1, %s1013_s9   ;;  %p1748_p13 = scmp.ne.s32.totalorder %s1744_s22, 0 }
 0x1d3   : > { %p1749_p4 = scmp.ge.s32.totalorder %s1025_s12, 2  ;;  %s741_s3 = scalar_lea.sflag [#allocation4], %s740_s30 }
 0x1d5   : > { %p828_p5 = pnand %p1749_p4, %p1748_p13 }
 0x1d7   : > { %p829_p7 = pneg %p828_p5 }
 0x1d9   : > { %1008 = dma.done.wait (%p829_p7), %s741_s3, 4096  }
 0x1da   : > { %1010 = vsyncadd (%p829_p7), %s741_s3, 4294963200  ;;  %p15_p8 = scmp.ge.s32.totalorder %s1073_s15, 4   ;;  %s1750_s9 = smov %s1017_s10 }
 0x1db   : > { %s1751_s10 = smov %s1021_s11  ;;  %s1752_s11 = smov %s1085_s18 }
 0x1dc   : > { %s1753_s12 = smov %s1073_s15  ;;  %17 = sbr.rel (!%p15_p8) target bundleno = 5 (0x5), region = 73 }
 0x1e1   :  { %746 = vsyncpa [#allocation3], 1 }
 0x1e2   :  { %748 = vsyncpa [#allocation3 + $0x1], 1 }
 0x1e3   :  { %749 = vsyncpa [#allocation4], 1 }
 0x1e4   :  { %751 = vsyncpa [#allocation4 + $0x1], 1 }

</bundles_post_ra>
